<compile_context>
chip_gen: v7x
topology: tpu7x:2x2x1
jax: 0.10.0
libtpu: 0.0.40
codegen_flags: <defaults>
</compile_context>

<pallas_src>
import functools

import jax
import jax.numpy as jnp
from jax.experimental import pallas as pl
from jax.experimental.pallas import tpu as pltpu


def rmsnorm_kernel(x_ref, w_ref, o_ref, *, d_model, eps):
    # x_ref: (tile_rows, d_model) in I/O dtype; w_ref: (1, d_model) f32.
    xf = x_ref[...].astype(jnp.float32)
    ss = jnp.sum(xf * xf, axis=-1, keepdims=True)        # f32 accumulation
    inv = jax.lax.rsqrt(ss / d_model + eps)               # EUP rsqrt, f32
    # Entire wide path in f32; the kernel is HBM-bound so the extra VALU work
    # hides under DMA. Single cast at the store.
    o_ref[...] = (xf * inv * w_ref[...]).astype(o_ref.dtype)


def _choose_tile_rows(rows, d_model, itemsize):
    # ~3 MiB per streaming input block: already on the HBM-roofline plateau
    # (measured ~85% of BW at 1-4 MiB blocks on v6e) while keeping the full-tile
    # f32 temporaries small (no vreg-spill pressure, fits v5e's scoped default
    # and v7x's 64 MiB physical VMEM with margin).
    block_budget = 3 * 1024 * 1024
    max_rows = block_budget // max(1, d_model * itemsize)
    tile = max(32, (max_rows // 32) * 32)   # multiple of 32: safe sublane packing
    # Keep >= ~8 grid steps whenever there is enough work: preserves in/out
    # DMA/compute overlap and lets the parallel row axis shard across v7x's
    # two TensorCores instead of collapsing to a single block.
    min_steps = 8
    if rows >= min_steps * 32:
        cap = max(32, (pl.cdiv(rows, min_steps) // 32) * 32)
        tile = min(tile, cap)
    if tile >= rows:
        return rows                          # tiny input: single full-extent block
    return tile


def _vmem_limit_bytes(tile_rows, d_model, itemsize):
    need = (4 * tile_rows * d_model * itemsize    # double-buffered in + out tiles
            + 3 * tile_rows * d_model * 4         # f32 temporaries inside the body
            + 2 * 4 * d_model                     # resident f32 weight
            + (2 << 20))                          # headroom
    try:
        cap = int(pltpu.get_tpu_info().vmem_capacity_bytes)
    except Exception:
        cap = 64 << 20                            # conservative: v7x physical VMEM
    # Clamp to 3/4 of physical VMEM so double-buffering stays alive on v7x
    # (64 MiB) as well as v5e/v6e (128 MiB).
    return int(min(max(need, 16 << 20), (cap * 3) // 4))


def _weight_spec(d_model):
    # Constant index_map -> single resident block; request single-buffering so
    # Pallas doesn't allocate a pointless second buffer / refetch DMA.
    try:
        return pl.BlockSpec((1, d_model), lambda i: (0, 0),
                            pipeline_mode=pl.Buffered(1))
    except TypeError:
        return pl.BlockSpec((1, d_model), lambda i: (0, 0))


def rmsnorm(x, weight, *, eps=1e-5, tile_rows=None):
    """x: (..., d_model), weight: (d_model,). Returns same shape/dtype as x."""
    orig_shape = x.shape
    d_model = orig_shape[-1]
    x2 = x.reshape(-1, d_model)
    rows = x2.shape[0]
    itemsize = x2.dtype.itemsize

    if tile_rows is None:
        tile_rows = _choose_tile_rows(rows, d_model, itemsize)
    tile_rows = max(1, min(tile_rows, rows))

    # Weight kept in f32 VMEM regardless of the I/O dtype: better numerics at
    # zero throughput cost, and avoids bf16 pack/unpack on v5e (no bf16 VPU).
    w2 = weight.reshape(1, d_model).astype(jnp.float32)

    # NOTE: d_model % 128 != 0 still runs correctly (full-extent lane block),
    # but falls onto the masked-partial-store slow path; keep d_model a
    # multiple of 128 for roofline throughput.
    grid = (pl.cdiv(rows, tile_rows),)   # ragged last row-block masked by Pallas

    kernel = functools.partial(rmsnorm_kernel, d_model=d_model, eps=eps)

    out = pl.pallas_call(
        kernel,
        out_shape=jax.ShapeDtypeStruct((rows, d_model), x.dtype),
        grid_spec=pltpu.PrefetchScalarGridSpec(
            num_scalar_prefetch=0,
            grid=grid,
            in_specs=[
                pl.BlockSpec((tile_rows, d_model), lambda i: (i, 0)),
                _weight_spec(d_model),
            ],
            out_specs=pl.BlockSpec((tile_rows, d_model), lambda i: (i, 0)),
        ),
        compiler_params=pltpu.CompilerParams(
            # Rows are embarrassingly parallel: lets v7x shard grid steps
            # across its 2 TensorCores; neutral on v5e/v6e.
            dimension_semantics=("parallel",),
            vmem_limit_bytes=_vmem_limit_bytes(tile_rows, d_model, itemsize),
        ),
    )(x2, w2)

    return out.reshape(orig_shape)


def rmsnorm_ref(x, weight, eps=1e-5):
    xf = x.astype(jnp.float32)
    d_model = x.shape[-1]
    rms = jnp.sum(jnp.square(xf), axis=-1, keepdims=True) / d_model + eps
    return xf / jnp.sqrt(rms) * weight.astype(jnp.float32)


if __name__ == "__main__":
    key = jax.random.PRNGKey(0)

    # Test 1: small f32, lane-dense d_model, single full-extent block.
    batch, seq, d_model = 2, 8, 128
    x = jax.random.normal(key, (batch, seq, d_model), dtype=jnp.float32)
    weight = jnp.ones((d_model,), dtype=jnp.float32)   # module init: ones
    out = rmsnorm(x, weight, eps=1e-5)
    jax.block_until_ready(out)
    ref = rmsnorm_ref(x, weight, eps=1e-5)
    assert out.shape == x.shape and out.dtype == x.dtype
    assert jnp.allclose(out, ref, atol=1e-5, rtol=1e-5)

    # Test 2: bf16 I/O with multi-step row grid (exercises f32 wide path +
    # pipelined row tiling).
    k2 = jax.random.PRNGKey(1)
    xb = jax.random.normal(k2, (4, 64, 256), dtype=jnp.bfloat16)
    wb = jnp.ones((256,), dtype=jnp.float32)
    outb = rmsnorm(xb, wb, eps=1e-5)
    jax.block_until_ready(outb)
    refb = rmsnorm_ref(xb, wb, eps=1e-5)
    assert outb.shape == xb.shape and outb.dtype == xb.dtype
    assert jnp.allclose(outb.astype(jnp.float32), refb, atol=2e-2, rtol=2e-2)

    print("KERNEL_OK")
</pallas_src>

<mosaic_0001>
module attributes {stable_mosaic.version = 11 : i64} {
  func.func @rmsnorm_kernel(%arg0: i32, %arg1: memref<16x128xf32, #tpu.memory_space<vmem>>, %arg2: memref<1x128xf32, #tpu.memory_space<vmem>>, %arg3: memref<16x128xf32, #tpu.memory_space<vmem>>) attributes {dimension_semantics = [#tpu.dimension_semantics<parallel>], iteration_bounds = array<i64: 1>, scalar_prefetch = 0 : i64, scratch_operands = 0 : i64, tpu.core_type = #tpu.core_type<tc>, window_params = [{transform_indices = @transform_0, window_bounds = array<i64: 16, 128>}, {pipeline_mode = #tpu.pipeline_mode<synchronous>, transform_indices = @transform_1, window_bounds = array<i64: 1, 128>}, {transform_indices = @transform_2, window_bounds = array<i64: 16, 128>}]} {
    %c0 = arith.constant 0 : index
    %c0_0 = arith.constant 0 : index
    %0 = vector.load %arg1[%c0, %c0_0] : memref<16x128xf32, #tpu.memory_space<vmem>>, vector<16x128xf32>
    %1 = arith.mulf %0, %0 : vector<16x128xf32>
    %cst = arith.constant dense<0.000000e+00> : vector<16xf32>
    %2 = vector.multi_reduction <add>, %1, %cst [1] : vector<16x128xf32> to vector<16xf32>
    %3 = vector.shape_cast %2 : vector<16xf32> to vector<16x1xf32>
    %cst_1 = arith.constant 1.280000e+02 : f32
    %4 = vector.broadcast %cst_1 : f32 to vector<16x1xf32>
    %5 = arith.divf %3, %4 : vector<16x1xf32>
    %cst_2 = arith.constant 9.99999974E-6 : f32
    %6 = vector.broadcast %cst_2 : f32 to vector<16x1xf32>
    %7 = arith.addf %5, %6 : vector<16x1xf32>
    %8 = math.rsqrt %7 : vector<16x1xf32>
    %9 = vector.broadcast %8 : vector<16x1xf32> to vector<16x128xf32>
    %10 = arith.mulf %0, %9 : vector<16x128xf32>
    %c0_3 = arith.constant 0 : index
    %c0_4 = arith.constant 0 : index
    %11 = vector.load %arg2[%c0_3, %c0_4] : memref<1x128xf32, #tpu.memory_space<vmem>>, vector<1x128xf32>
    %12 = vector.broadcast %11 : vector<1x128xf32> to vector<16x128xf32>
    %13 = arith.mulf %10, %12 : vector<16x128xf32>
    %c0_5 = arith.constant 0 : index
    %c0_6 = arith.constant 0 : index
    %14 = vector.load %arg3[%c0_5, %c0_6] : memref<16x128xf32, #tpu.memory_space<vmem>>, vector<16x128xf32>
    tpu.vector_store %arg3[%c0_5, %c0_6], %13 {strides = array<i32>} : memref<16x128xf32, #tpu.memory_space<vmem>>, vector<16x128xf32>,
    return
  }
  func.func @transform_0(%arg0: i32) -> (i32, i32) {
    %c0_i32 = arith.constant 0 : i32
    %c0_i32_0 = arith.constant 0 : i32
    return %arg0, %c0_i32 : i32, i32
  }
  func.func @transform_1(%arg0: i32) -> (i32, i32) {
    %c0_i32 = arith.constant 0 : i32
    %c0_i32_0 = arith.constant 0 : i32
    %c0_i32_1 = arith.constant 0 : i32
    return %c0_i32, %c0_i32_0 : i32, i32
  }
  func.func @transform_2(%arg0: i32) -> (i32, i32) {
    %c0_i32 = arith.constant 0 : i32
    %c0_i32_0 = arith.constant 0 : i32
    return %arg0, %c0_i32 : i32, i32
  }
}

</mosaic_0001>

<bundles_post_ra>
// kernel: tpu_custom_call.1
= control target key start
LH: loop header
LB: loop body
LE: loop exit
PB: predicated region body
PF: predicated region fallthrough
CT: control target
= control target key end

     0   :  { %7 = vsyncpa [#allocation3], 0  ;;  %s180_s0 = inlined_call_operand.hbm [shape: f32[16,128], index: 0, kind: input, shape index: {}]   ;;  %s181_s1 = inlined_call_operand.vmem [shape: f32[1,128], index: 1, kind: input, shape index: {}]   ;;  %s182_s2 = inlined_call_operand.hbm [shape: f32[16,128], index: 2, kind: output, shape index: {}]  }
   0x1   :  { %8 = vsyncpa [#allocation4], 0  ;;  %s128_s9 = smov [#allocation2]   ;;  %s80_s13 = scalar_lea.hbm %s180_s0, 256 }
   0x2   :  { %s14_s10 = sshll.u32 %s128_s9, 4  ;;  %p81_p0 = scmp.ne.s32.totalorder %s180_s0, %s80_s13  ;;  %s15_s10 = int_to_ptr.vmem [resolvable:$true] %s14_s10 }
   0x3   :  { %p84_p1 = scmp.lt.u32.totalorder %s80_s13, %s180_s0 }
   0x5   :  { %p86_p2 = pnand %p84_p1, %p81_p0 }
   0x7   :  { %89 = shalt.err (!%p86_p2)
}
   0x8   :  { %s90_s18 = scalar_lea.vmem %s15_s10, 256  ;;  %p95_p4 = scmp.lt.s32.totalorder %s15_s10, %s15_s10 }
   0x9   :  { %p91_p3 = scmp.ne.s32.totalorder %s15_s10, %s90_s18  ;;  %p96_p5 = scmp.lt.s32.totalorder %s90_s18, %s90_s18 }
   0xb   :  { %p97_p6 = por %p96_p5, %p95_p4 }
   0xd   :  { %p98_p7 = pnand %p97_p6, %p91_p3 }
   0xf   :  { %101 = shalt.err (!%p98_p7)
}
  0x10   :  { %s129_s19 = smov 128   ;;  %s130_s20 = smov 8  }
  0x11   :  { %20 = dma.hbm_to_vmem [thread:$0]  %s180_s0, 256, %s15_s10, [#allocation3], %s129_s19, %s129_s19, %s130_s20  }
  0x12   :  { %124 = dma.done.wait [#allocation3], 256  }
  0x13   :  { %125 = vsyncadd [#allocation3], 4294967040  ;;  %v26_v0 = vld [vmem:[#allocation2] sm:$0xff]  ;;  %v27_v1 = vld [vmem:[#allocation2 + $0x8] sm:$0xff]  ;;  %s131_s0 = smov [#allocation5]  }
  0x14   :  { %v28_v2 = vmul.f32 %v26_v0, %v26_v0  ;;  %v29_v3 = vmul.f32 %v27_v1, %v27_v1  ;;  %v71_v11 = vld [vmem:[%s181_s1] ss:$0 sm:$0xff]  ;;  %s59_s25 = sshll.u32 %s131_s0, 4  ;;  %s60_s25 = int_to_ptr.vmem [resolvable:$true] %s59_s25 }
  0x15   :  { %s102_s26 = scalar_lea.vmem %s60_s25, 256  ;;  %p107_p9 = scmp.lt.s32.totalorder %s60_s25, %s60_s25 }
  0x16   :  { %30 = vadd.xlane.f32.xlu0 %v28_v2  ;;  %p103_p8 = scmp.ne.s32.totalorder %s60_s25, %s102_s26  ;;  %p108_p10 = scmp.lt.s32.totalorder %s102_s26, %s102_s26 }
  0x18   :  { %p109_p11 = por %p108_p10, %p107_p9 }
  0x1a   :  { %32 = vadd.xlane.f32.xlu0 %v29_v3  ;;  %p110_p12 = pnand %p109_p11, %p103_p8 }
  0xa3   :  { %v31_v4 = vpop.xlane.xlu0 %30 }
  0xa4   :  { %v35_v5 = vmul.f32 0.0078125, %v31_v4 }
  0xa6   :  { %v37_v6 = vadd.f32 1e-05, %v35_v5 }
  0xa7   :  { %v33_v7 = vpop.xlane.xlu0 %32 }
  0xa8   :  { %76 = vrsqrt.f32 %v37_v6  ;;  %v36_v8 = vmul.f32 0.0078125, %v33_v7 }
  0xaa   :  { %v38_v9 = vadd.f32 1e-05, %v36_v8 }
  0xac   :  { %78 = vrsqrt.f32 %v38_v9 }
  0xb2   :  { %v77_v10 = vpop.eup %76 }
  0xb3   :  { %v41_v12 = vmul.f32 %v77_v10, %v26_v0 }
  0xb5   :  { %v50_v13 = vmul.f32 %v71_v11, %v41_v12 }
  0xb6   :  { %v79_v14 = vpop.eup %78 }
  0xb7   :  { %v42_v15 = vmul.f32 %v79_v14, %v27_v1  ;;  %52 = vst [vmem:[#allocation5] sm:$0xff] %v50_v13 }
  0xb9   :  { %v51_v16 = vmul.f32 %v71_v11, %v42_v15 }
  0xbb   :  { %53 = vst [vmem:[#allocation5 + $0x8] sm:$0xff] %v51_v16 }
  0xbc   :  { %113 = shalt.err (!%p110_p12)
}
  0xbd   :  { %s114_s1 = scalar_lea.hbm %s182_s2, 256 }
  0xbe   :  { %p115_p13 = scmp.ne.s32.totalorder %s182_s2, %s114_s1  ;;  %p118_p0 = scmp.lt.u32.totalorder %s114_s1, %s182_s2 }
  0xc0   :  { %p120_p1 = pnand %p118_p0, %p115_p13 }
  0xc2   :  { %123 = shalt.err (!%p120_p1)
}
  0xc3   :  { %65 = dma.vmem_to_hbm [thread:$0]  %s60_s25, 256, %s182_s2, [#allocation4], %s129_s19, %s129_s19, %s130_s20  }
  0xc4   :  { %126 = dma.done.wait [#allocation4], 256  }
  0xc5   :  { %127 = vsyncadd [#allocation4], 4294967040 }
  0xc6   :  { %69 = vsyncpa [#allocation3], 1 }
  0xc7   :  { %70 = vsyncpa [#allocation4], 1 }

</bundles_post_ra>
